<compile_context>
chip_gen: v7x
topology: tpu7x:2x2x1
jax: 0.10.0
libtpu: 0.0.40
codegen_flags: <defaults>
</compile_context>

<pallas_src>
import functools

import jax
import jax.numpy as jnp
from jax import lax
from jax.experimental import pallas as pl
from jax.experimental.pallas import tpu as pltpu

EPS = 1e-5
MOMENTUM = 0.1

_FUSED_IO_BUDGET = 24 * 1024 * 1024     # cap on in+out VMEM working set for the fused path
_VMEM_LIMIT = 32 * 1024 * 1024          # scoped-VMEM limit we request (<= physical on v5e/v6e/v7x)
_TILE_TARGET_BYTES = 4 * 1024 * 1024    # per-tile target for the tiled path


def _lane_chunk(spatial):
    """Widest inner chunk (multiple of 128 lanes) that divides `spatial`."""
    for w in (1024, 512, 256, 128):
        if spatial % w == 0:
            return w
    return 128


def _fused_bn_kernel(x_ref, w_ref, b_ref, out_ref, mv_ref, *, inv_n, eps):
    """Single-call path: stats + normalize with x fully resident in VMEM.

    x_ref/out_ref: (N, C, S);  w_ref/b_ref: (C, 1) cluster-0 params;
    mv_ref: (C, 2) columns = [mean, biased var] (for the running-stat update)."""
    n_b, n_c, spatial = x_ref.shape
    w_chunk = _lane_chunk(spatial)
    n_main = spatial // w_chunk
    rem = spatial - n_main * w_chunk

    # --- per-channel sum / sumsq: VPU adds into lane-wide accumulators ------
    if n_main > 0:
        def stat_body(j, carry):
            acc_s, acc_q = carry
            off = pl.multiple_of(j * w_chunk, w_chunk)
            chunk = x_ref[:, :, pl.ds(off, w_chunk)]           # (N, C, w_chunk)
            return (acc_s + jnp.sum(chunk, axis=0),
                    acc_q + jnp.sum(chunk * chunk, axis=0))

        zero = jnp.zeros((n_c, w_chunk), jnp.float32)
        acc_s, acc_q = lax.fori_loop(0, n_main, stat_body, (zero, zero))
        s_c1 = jnp.sum(acc_s, axis=1, keepdims=True)           # (C, 1) single XLU reduce
        q_c1 = jnp.sum(acc_q, axis=1, keepdims=True)
    else:
        s_c1 = jnp.zeros((n_c, 1), jnp.float32)
        q_c1 = jnp.zeros((n_c, 1), jnp.float32)
    if rem:                                                    # static tail (S % 128 != 0)
        tail = x_ref[:, :, n_main * w_chunk:]                  # (N, C, rem)
        s_c1 = s_c1 + jnp.sum(tail, axis=(0, 2), keepdims=True)[0]
        q_c1 = q_c1 + jnp.sum(tail * tail, axis=(0, 2), keepdims=True)[0]

    # --- finalize: mean / biased var, fold affine into scale / shift --------
    mean = s_c1 * inv_n                                        # (C, 1)
    var = jnp.maximum(q_c1 * inv_n - mean * mean, 0.0)         # clamp f32 cancellation
    scale = w_ref[...] * lax.rsqrt(var + eps)                  # rsqrt -> EUP slot
    shift = b_ref[...] - mean * scale
    mv_ref[:, 0:1] = mean
    mv_ref[:, 1:2] = var

    # --- normalize: out = x * scale + shift (2 VALU ops / element) ----------
    if n_main > 0:
        def norm_body(j, _):
            off = pl.multiple_of(j * w_chunk, w_chunk)
            out_ref[:, :, pl.ds(off, w_chunk)] = (
                x_ref[:, :, pl.ds(off, w_chunk)] * scale + shift)
            return 0
        lax.fori_loop(0, n_main, norm_body, 0)
    if rem:
        out_ref[:, :, n_main * w_chunk:] = (
            x_ref[:, :, n_main * w_chunk:] * scale + shift)


def _tile_stats_kernel(x_ref, out_ref):
    """Tiled pass 1: per-tile per-channel partial [sum, sumsq].

    x_ref: (N, C, ts);  out_ref: (1, C, 2).  Only VPU adds per vreg of x; the
    cross-lane XLU reduce happens once per tile (amortized to ~nothing)."""
    n_b, n_c, ts = x_ref.shape
    w_chunk = _lane_chunk(ts)

    def body(j, carry):
        acc_s, acc_q = carry
        off = pl.multiple_of(j * w_chunk, w_chunk)
        chunk = x_ref[:, :, pl.ds(off, w_chunk)]               # (N, C, w_chunk)
        return (acc_s + jnp.sum(chunk, axis=0),
                acc_q + jnp.sum(chunk * chunk, axis=0))

    zero = jnp.zeros((n_c, w_chunk), jnp.float32)
    acc_s, acc_q = lax.fori_loop(0, ts // w_chunk, body, (zero, zero))
    out_ref[0, :, 0:1] = jnp.sum(acc_s, axis=1, keepdims=True)
    out_ref[0, :, 1:2] = jnp.sum(acc_q, axis=1, keepdims=True)


def _normalize_kernel(x_ref, ss_ref, out_ref):
    """Tiled pass 2: out = x * scale + shift, lane-dense store.

    x_ref/out_ref: (N, C, ts);  ss_ref: (2, C, 1) rows = [scale, shift]."""
    out_ref[...] = x_ref[...] * ss_ref[0:1, :, :] + ss_ref[1:2, :, :]


def _plan_tiles(spatial, channels, batch, target_bytes):
    """Pick (tile, num_tiles, padded_spatial).  The tile is a multiple of 128
    lanes sized to ~target_bytes per (batch, C, tile) block.  Prefer an exact
    divisor of `spatial` (no padding); otherwise zero-pad the spatial axis up
    to a multiple of the tile."""
    max_lanes = max(128, (target_bytes // (batch * channels * 4)) // 128 * 128)
    if spatial <= max_lanes:
        padded = -(-spatial // 128) * 128
        return padded, 1, padded
    if spatial % 128 == 0:
        best = 128
        t = 128
        while t <= max_lanes:
            if spatial % t == 0:
                best = t
            t += 128
        if best * 8 >= max_lanes:     # divisor big enough -> skip the pad copy
            return best, spatial // best, spatial
    tile = max_lanes
    padded = -(-spatial // tile) * tile
    return tile, padded // tile, padded


@functools.partial(jax.jit, static_argnames=("force_two_pass", "tile_target_bytes"))
def pcq_bn_relu(x_nchw, weight, bias, running_mean, running_var, *,
                force_two_pass=False, tile_target_bytes=_TILE_TARGET_BYTES):
    """Forward pass of PCQBnReLU.  x_nchw: (3, C, H, W) float32.

    Returns (out_nchw, new_running_mean, new_running_var).
    NOTE: the reference forward applies NO ReLU; do not add one."""
    n_b, n_c, h, w = x_nchw.shape
    assert n_b == 3, "PCQBnReLU.forward implies batch size 3 (bc = [0, 0, 0])"
    spatial = h * w
    count = n_b * spatial
    inv_n = 1.0 / float(count)

    x_k = x_nchw.reshape(n_b, n_c, spatial).astype(jnp.float32)   # free reshape
    w0 = weight[0].astype(jnp.float32).reshape(n_c, 1)            # cluster-0 params
    b0 = bias[0].astype(jnp.float32).reshape(n_c, 1)

    x_bytes = n_b * n_c * spatial * 4
    use_fused = (2 * x_bytes <= _FUSED_IO_BUDGET) and not force_two_pass

    if use_fused:
        # --- fused single-call path: x read from HBM exactly once ----------
        out_k, mv = pl.pallas_call(
            functools.partial(_fused_bn_kernel, inv_n=inv_n, eps=EPS),
            out_shape=(jax.ShapeDtypeStruct((n_b, n_c, spatial), jnp.float32),
                       jax.ShapeDtypeStruct((n_c, 2), jnp.float32)),
            compiler_params=pltpu.CompilerParams(vmem_limit_bytes=_VMEM_LIMIT),
        )(x_k, w0, b0)
        mean, var = mv[:, 0], mv[:, 1]
    else:
        # --- tiled two-pass path --------------------------------------------
        tile, num_tiles, padded = _plan_tiles(spatial, n_c, n_b, tile_target_bytes)
        x_p = x_k if padded == spatial else jnp.pad(
            x_k, ((0, 0), (0, 0), (0, padded - spatial)))

        # Pass 1: per-tile partial stats; "parallel" so v7x can use both cores.
        tile_stats = pl.pallas_call(
            _tile_stats_kernel,
            grid=(num_tiles,),
            in_specs=[pl.BlockSpec((n_b, n_c, tile), lambda t: (0, 0, t))],
            out_specs=pl.BlockSpec((1, n_c, 2), lambda t: (t, 0, 0)),
            out_shape=jax.ShapeDtypeStruct((num_tiles, n_c, 2), jnp.float32),
            compiler_params=pltpu.CompilerParams(
                dimension_semantics=("parallel",),
                vmem_limit_bytes=_VMEM_LIMIT),
        )(x_p)

        # Tiny combine + affine fold; fuses into the same XLA program under jit.
        sums = jnp.sum(tile_stats, axis=0)                       # (C, 2)
        mean = sums[:, 0] * inv_n
        var = jnp.maximum(sums[:, 1] * inv_n - mean * mean, 0.0)
        scale = w0[:, 0] * lax.rsqrt(var + EPS)
        shift = b0[:, 0] - mean * scale
        scale_shift = jnp.stack([scale, shift], axis=0).reshape(2, n_c, 1)

        # Pass 2: elementwise normalize, "parallel" over spatial tiles.
        # (input_output_aliases={0: 0} would save an HBM buffer if the caller
        #  could donate x; left off so x remains usable.)
        out_p = pl.pallas_call(
            _normalize_kernel,
            grid=(num_tiles,),
            in_specs=[pl.BlockSpec((n_b, n_c, tile), lambda t: (0, 0, t)),
                      pl.BlockSpec((2, n_c, 1), lambda t: (0, 0, 0))],
            out_specs=pl.BlockSpec((n_b, n_c, tile), lambda t: (0, 0, t)),
            out_shape=jax.ShapeDtypeStruct((n_b, n_c, padded), jnp.float32),
            compiler_params=pltpu.CompilerParams(
                dimension_semantics=("parallel",),
                vmem_limit_bytes=_VMEM_LIMIT),
        )(x_p, scale_shift)
        out_k = out_p[:, :, :spatial]

    out = out_k.reshape(n_b, n_c, h, w)

    # Running-stat side effect for cluster 0 (exists == [0]); tiny (C,) math.
    unbias = float(count) / float(count - 1)
    new_rm = running_mean.at[0].set(
        running_mean[0] * (1.0 - MOMENTUM) + mean * MOMENTUM)
    new_rv = running_var.at[0].set(
        running_var[0] * (1.0 - MOMENTUM) + var * MOMENTUM * unbias)
    return out, new_rm, new_rv


def reference_forward(x, weight, bias):
    """Pure-JAX reference mirroring the PyTorch forward (NCHW, no ReLU)."""
    m = x.mean(axis=(0, 2, 3))
    v = ((x - m[None, :, None, None]) ** 2).mean(axis=(0, 2, 3))
    out = (x - m[None, :, None, None]) / jnp.sqrt(v[None, :, None, None] + EPS)
    return out * weight[0][None, :, None, None] + bias[0][None, :, None, None]


if __name__ == "__main__":
    num_features = 16
    batch = 3                      # required by the module's forward (bc = [0, 0, 0])

    key = jax.random.PRNGKey(0)
    kx1, kx2, kw, kb = jax.random.split(key, 4)

    # __init__ uses ones/zeros; randomize slightly to exercise the affine path.
    weight = 1.0 + 0.1 * jax.random.normal(kw, (4, num_features), jnp.float32)
    bias = 0.1 * jax.random.normal(kb, (4, num_features), jnp.float32)
    running_mean = jnp.zeros((4, num_features), jnp.float32)
    running_var = jnp.ones((4, num_features), jnp.float32)

    def check(x, **kwargs):
        out, nrm, nrv = pcq_bn_relu(x, weight, bias, running_mean, running_var,
                                    **kwargs)
        jax.block_until_ready((out, nrm, nrv))
        ref = reference_forward(x, weight, bias)
        assert out.shape == x.shape and out.dtype == jnp.float32
        assert jnp.allclose(out, ref, rtol=1e-4, atol=1e-4), "output mismatch"
        n = float(x.shape[0] * x.shape[2] * x.shape[3])
        m_ref = x.mean(axis=(0, 2, 3))
        v_ref = ((x - m_ref[None, :, None, None]) ** 2).mean(axis=(0, 2, 3))
        rm_ref = running_mean.at[0].set(
            running_mean[0] * (1 - MOMENTUM) + m_ref * MOMENTUM)
        rv_ref = running_var.at[0].set(
            running_var[0] * (1 - MOMENTUM) + v_ref * MOMENTUM * n / (n - 1.0))
        assert jnp.allclose(nrm, rm_ref, rtol=1e-4, atol=1e-4), "running_mean mismatch"
        assert jnp.allclose(nrv, rv_ref, rtol=1e-4, atol=1e-4), "running_var mismatch"

    # 1) Fused single-call path (S = 3072, x = 576 KiB -> well under budget).
    x1 = jax.random.normal(kx1, (batch, num_features, 48, 64), jnp.float32)
    check(x1)
    # 2) Tiled two-pass path on the same input (six parallel 512-lane tiles).
    check(x1, force_two_pass=True, tile_target_bytes=128 * 1024)
    # 3) Fused path with a spatial size that is not a multiple of 128 (tail).
    x2 = jax.random.normal(kx2, (batch, num_features, 47, 31), jnp.float32)
    check(x2)
    # 4) Tiled path with zero-padding of the spatial axis (S = 1457 -> 1920).
    check(x2, force_two_pass=True, tile_target_bytes=128 * 1024)

    print("KERNEL_OK")
</pallas_src>

<mosaic_0001>
module attributes {stable_mosaic.version = 11 : i64} {
  func.func @_fused_bn_kernel(%arg0: memref<3x16x3072xf32, #tpu.memory_space<vmem>>, %arg1: memref<16x1xf32, #tpu.memory_space<vmem>>, %arg2: memref<16x1xf32, #tpu.memory_space<vmem>>, %arg3: memref<3x16x3072xf32, #tpu.memory_space<vmem>>, %arg4: memref<16x2xf32, #tpu.memory_space<vmem>>) attributes {dimension_semantics = [], scalar_prefetch = 0 : i64, scratch_operands = 0 : i64, tpu.core_type = #tpu.core_type<tc>} {
    %cst = arith.constant 0.000000e+00 : f32
    %0 = vector.broadcast %cst : f32 to vector<16x1024xf32>
    %c0_i32 = arith.constant 0 : i32
    %c3_i32 = arith.constant 3 : i32
    %1 = arith.addi %c0_i32, %c3_i32 : i32
    %c1_i32 = arith.constant 1 : i32
    %2:2 = scf.for %arg5 = %c0_i32 to %1 step %c1_i32 iter_args(%arg6 = %0, %arg7 = %0) -> (vector<16x1024xf32>, vector<16x1024xf32>)  : i32 {
      %c1024_i32 = arith.constant 1024 : i32
      %26 = arith.muli %arg5, %c1024_i32 : i32
      %27 = tpu.assume_multiple %26, 1024 : i32
      %c0_17 = arith.constant 0 : index
      %c0_18 = arith.constant 0 : index
      %28 = arith.index_cast %27 : i32 to index
      %29 = vector.load %arg0[%c0_17, %c0_18, %28] : memref<3x16x3072xf32, #tpu.memory_space<vmem>>, vector<3x16x1024xf32>
      %cst_19 = arith.constant dense<0.000000e+00> : vector<16x1024xf32>
      %30 = vector.multi_reduction <add>, %29, %cst_19 [0] : vector<3x16x1024xf32> to vector<16x1024xf32>
      %31 = arith.addf %arg6, %30 : vector<16x1024xf32>
      %32 = arith.mulf %29, %29 : vector<3x16x1024xf32>
      %cst_20 = arith.constant dense<0.000000e+00> : vector<16x1024xf32>
      %33 = vector.multi_reduction <add>, %32, %cst_20 [0] : vector<3x16x1024xf32> to vector<16x1024xf32>
      %34 = arith.addf %arg7, %33 : vector<16x1024xf32>
      scf.yield %31, %34 : vector<16x1024xf32>, vector<16x1024xf32>
    }
    %c3_i32_0 = arith.constant 3 : i32
    %cst_1 = arith.constant dense<0.000000e+00> : vector<16xf32>
    %3 = vector.multi_reduction <add>, %2#0, %cst_1 [1] : vector<16x1024xf32> to vector<16xf32>
    %4 = vector.shape_cast %3 : vector<16xf32> to vector<16x1xf32>
    %cst_2 = arith.constant dense<0.000000e+00> : vector<16xf32>
    %5 = vector.multi_reduction <add>, %2#1, %cst_2 [1] : vector<16x1024xf32> to vector<16xf32>
    %6 = vector.shape_cast %5 : vector<16xf32> to vector<16x1xf32>
    %cst_3 = arith.constant 1.08506945E-4 : f32
    %7 = vector.broadcast %cst_3 : f32 to vector<16x1xf32>
    %8 = arith.mulf %4, %7 : vector<16x1xf32>
    %cst_4 = arith.constant 1.08506945E-4 : f32
    %9 = vector.broadcast %cst_4 : f32 to vector<16x1xf32>
    %10 = arith.mulf %6, %9 : vector<16x1xf32>
    %11 = arith.mulf %8, %8 : vector<16x1xf32>
    %12 = arith.subf %10, %11 : vector<16x1xf32>
    %cst_5 = arith.constant 0.000000e+00 : f32
    %13 = vector.broadcast %cst_5 : f32 to vector<16x1xf32>
    %14 = arith.maximumf %12, %13 : vector<16x1xf32>
    %c0 = arith.constant 0 : index
    %c0_6 = arith.constant 0 : index
    %15 = vector.load %arg1[%c0, %c0_6] : memref<16x1xf32, #tpu.memory_space<vmem>>, vector<16x1xf32>
    %cst_7 = arith.constant 9.99999974E-6 : f32
    %16 = vector.broadcast %cst_7 : f32 to vector<16x1xf32>
    %17 = arith.addf %14, %16 : vector<16x1xf32>
    %18 = math.rsqrt %17 : vector<16x1xf32>
    %19 = arith.mulf %15, %18 : vector<16x1xf32>
    %c0_8 = arith.constant 0 : index
    %c0_9 = arith.constant 0 : index
    %20 = vector.load %arg2[%c0_8, %c0_9] : memref<16x1xf32, #tpu.memory_space<vmem>>, vector<16x1xf32>
    %21 = arith.mulf %8, %19 : vector<16x1xf32>
    %22 = arith.subf %20, %21 : vector<16x1xf32>
    %c0_10 = arith.constant 0 : index
    %c0_11 = arith.constant 0 : index
    %23 = vector.load %arg4[%c0_10, %c0_11] : memref<16x2xf32, #tpu.memory_space<vmem>>, vector<16x1xf32>
    tpu.vector_store %arg4[%c0_10, %c0_11], %8 {strides = array<i32>} : memref<16x2xf32, #tpu.memory_space<vmem>>, vector<16x1xf32>,
    %c0_12 = arith.constant 0 : index
    %c1 = arith.constant 1 : index
    %24 = vector.load %arg4[%c0_12, %c1] : memref<16x2xf32, #tpu.memory_space<vmem>>, vector<16x1xf32>
    tpu.vector_store %arg4[%c0_12, %c1], %14 {strides = array<i32>} : memref<16x2xf32, #tpu.memory_space<vmem>>, vector<16x1xf32>,
    %c0_i32_13 = arith.constant 0 : i32
    %c3_i32_14 = arith.constant 3 : i32
    %25 = arith.addi %c0_i32_13, %c3_i32_14 : i32
    %c1_i32_15 = arith.constant 1 : i32
    scf.for %arg5 = %c0_i32_13 to %25 step %c1_i32_15  : i32 {
      %c1024_i32 = arith.constant 1024 : i32
      %26 = arith.muli %arg5, %c1024_i32 : i32
      %27 = tpu.assume_multiple %26, 1024 : i32
      %c0_17 = arith.constant 0 : index
      %c0_18 = arith.constant 0 : index
      %28 = arith.index_cast %27 : i32 to index
      %29 = vector.load %arg0[%c0_17, %c0_18, %28] : memref<3x16x3072xf32, #tpu.memory_space<vmem>>, vector<3x16x1024xf32>
      %30 = vector.shape_cast %19 : vector<16x1xf32> to vector<1x16x1xf32>
      %31 = vector.broadcast %30 : vector<1x16x1xf32> to vector<3x16x1024xf32>
      %32 = arith.mulf %29, %31 : vector<3x16x1024xf32>
      %33 = vector.shape_cast %22 : vector<16x1xf32> to vector<1x16x1xf32>
      %34 = vector.broadcast %33 : vector<1x16x1xf32> to vector<3x16x1024xf32>
      %35 = arith.addf %32, %34 : vector<3x16x1024xf32>
      %c0_19 = arith.constant 0 : index
      %c0_20 = arith.constant 0 : index
      %36 = arith.index_cast %27 : i32 to index
      %37 = vector.load %arg3[%c0_19, %c0_20, %36] : memref<3x16x3072xf32, #tpu.memory_space<vmem>>, vector<3x16x1024xf32>
      tpu.vector_store %arg3[%c0_19, %c0_20, %36], %35 {strides = array<i32>} : memref<3x16x3072xf32, #tpu.memory_space<vmem>>, vector<3x16x1024xf32>,
    }
    %c3_i32_16 = arith.constant 3 : i32
    return
  }
}

</mosaic_0001>

<bundles_post_ra>
// kernel: pcq_bn_relu.1
= control target key start
LH: loop header
LB: loop body
LE: loop exit
PB: predicated region body
PF: predicated region fallthrough
CT: control target
= control target key end

     0   :  { %v1244_v0 = vmov 0.0   ;;  %v1246_v1 = vmov 0.0   ;;  %v1248_v2 = vmov 0.0   ;;  %v1250_v3 = vmov 0.0   ;;  %s1308_s15 = smov 0   ;;  %s2090_s0 = inlined_call_operand.vmem [shape: f32[3,16,3072], index: 0, kind: input, shape index: {}]   ;;  %s2091_s1 = inlined_call_operand.vmem [shape: f32[16,1], index: 1, kind: input, shape index: {}]   ;;  %s2092_s2 = inlined_call_operand.vmem [shape: f32[16,1], index: 2, kind: input, shape index: {}]   ;;  %s2093_s3 = inlined_call_operand.vmem [shape: f32[3,16,3072], index: 3, kind: output, shape index: {0}]   ;;  %s2094_s4 = inlined_call_operand.vmem [shape: f32[16,2], index: 4, kind: output, shape index: {1}]  }
   0x1   :  { %v1252_v4 = vmov 0.0   ;;  %v1254_v5 = vmov 0.0   ;;  %v1256_v6 = vmov 0.0   ;;  %v1258_v7 = vmov 0.0  }
   0x2   :  { %v1260_v8 = vmov 0.0   ;;  %v1262_v9 = vmov 0.0   ;;  %v1264_v10 = vmov 0.0   ;;  %v1266_v11 = vmov 0.0  }
   0x3   :  { %v1268_v12 = vmov 0.0   ;;  %v1270_v13 = vmov 0.0   ;;  %v1272_v14 = vmov 0.0   ;;  %v1274_v15 = vmov 0.0  }
   0x4   :  { %v1276_v16 = vmov 0.0   ;;  %v1278_v17 = vmov 0.0   ;;  %v1280_v18 = vmov 0.0   ;;  %v1282_v19 = vmov 0.0  }
   0x5   :  { %v1284_v20 = vmov 0.0   ;;  %v1286_v21 = vmov 0.0   ;;  %v1288_v22 = vmov 0.0   ;;  %v1290_v23 = vmov 0.0  }
   0x6   :  { %v1292_v24 = vmov 0.0   ;;  %v1294_v25 = vmov 0.0   ;;  %v1296_v26 = vmov 0.0   ;;  %v1298_v27 = vmov 0.0  }
   0x7   :  { %v1300_v28 = vmov 0.0   ;;  %v1302_v29 = vmov 0.0   ;;  %v1304_v30 = vmov 0.0   ;;  %v1306_v31 = vmov 0.0  }
   0x8 LB: > { %2125 = vst [vmem:[#allocation2_spill] sm:$0xff] %v1084_v0  ;;  %2126 = vst [vmem:[#allocation3_spill] sm:$0xff] %v1088_v1  ;;  %s662_s16 = sshll.u32 %s1212_s15, 10  ;;  %s21_s22 = sadd.s32 1, %s1212_s15   ;;  %s1212_s15 = sphi %s1308_s15, %s2270_s15   ;;  %v1208_v31 = vphi %v1306_v31, %v2269_v31   ;;  %v1204_v30 = vphi %v1304_v30, %v2268_v30   ;;  %v1200_v29 = vphi %v1302_v29, %v2267_v29   ;;  %v1196_v28 = vphi %v1300_v28, %v2266_v28   ;;  %v1192_v27 = vphi %v1298_v27, %v2265_v27   ;;  %v1188_v26 = vphi %v1296_v26, %v2264_v26   ;;  %v1184_v25 = vphi %v1294_v25, %v2263_v25   ;;  %v1180_v24 = vphi %v1292_v24, %v2262_v24   ;;  %v1176_v23 = vphi %v1290_v23, %v2261_v23   ;;  %v1172_v22 = vphi %v1288_v22, %v2260_v22   ;;  %v1168_v21 = vphi %v1286_v21, %v2259_v21   ;;  %v1164_v20 = vphi %v1284_v20, %v2258_v20   ;;  %v1160_v19 = vphi %v1282_v19, %v2257_v19   ;;  %v1156_v18 = vphi %v1280_v18, %v2256_v18   ;;  %v1152_v17 = vphi %v1278_v17, %v2255_v17   ;;  %v1148_v16 = vphi %v1276_v16, %v2254_v16   ;;  %v1144_v15 = vphi %v1274_v15, %v2253_v15   ;;  %v1140_v14 = vphi %v1272_v14, %v2252_v14   ;;  %v1136_v13 = vphi %v1270_v13, %v2251_v13   ;;  %v1132_v12 = vphi %v1268_v12, %v2250_v12   ;;  %v1128_v11 = vphi %v1266_v11, %v2249_v11   ;;  %v1124_v10 = vphi %v1264_v10, %v2248_v10   ;;  %v1120_v9 = vphi %v1262_v9, %v2247_v9   ;;  %v1116_v8 = vphi %v1260_v8, %v2245_v8   ;;  %v1112_v7 = vphi %v1258_v7, %v2243_v7   ;;  %v1108_v6 = vphi %v1256_v6, %v2242_v6   ;;  %v1104_v5 = vphi %v1254_v5, %v2241_v5   ;;  %v1100_v4 = vphi %v1252_v4, %v2240_v4   ;;  %v1096_v3 = vphi %v1250_v3, %v2239_v3   ;;  %v1092_v2 = vphi %v1248_v2, %v2238_v2   ;;  %v1088_v1 = vphi %v1246_v1, %v2237_v1   ;;  %v1084_v0 = vphi %v1244_v0, %v2236_v0  }
   0x9   : > { %2127 = vst [vmem:[#allocation4_spill] sm:$0xff] %v1092_v2  ;;  %2128 = vst [vmem:[#allocation5_spill] sm:$0xff] %v1096_v3  ;;  %s55_s17 = sshra.s32 %s662_s16, 7  ;;  %p1778_p0 = scmp.ge.s32.totalorder %s21_s22, 3  }
   0xa   : > { %2129 = vst [vmem:[#allocation6_spill] sm:$0xff] %v1100_v4  ;;  %2130 = vst [vmem:[#allocation7_spill] sm:$0xff] %v1104_v5  ;;  %s663_s18 = sshll.u32 %s55_s17, 3  ;;  %s2270_s15 = smov %s21_s22  ;;  %vm311_vm0 = vcmask (%p1778_p0), 7168   ;;  %vm314_vm1 = vcmask (%p1778_p0), 15368  }
   0xb   : > { %2131 = vst [vmem:[#allocation8_spill] sm:$0xff] %v1108_v6  ;;  %2132 = vst [vmem:[#allocation9_spill] sm:$0xff] %v1112_v7  ;;  %s1413_s21 = scalar_lea.vmem %s2090_s0, %s663_s18 }
   0xc   : > { %2133 = vst [vmem:[#allocation10_spill] sm:$0xff] %v1116_v8  ;;  %2134 = vst [vmem:[#allocation11_spill] sm:$0xff] %v1120_v9  ;;  %v1416_v32 = vld [vmem:[%s1413_s21] sm:$0xff]  ;;  %v1419_v33 = vld [vmem:[%s1413_s21 + $0x8] sm:$0xff] }
   0xd   : > { %2135 = vst [vmem:[#allocation12_spill] sm:$0xff] %v1124_v10  ;;  %2136 = vst [vmem:[#allocation13_spill] sm:$0xff] %v1128_v11  ;;  %v1422_v34 = vld [vmem:[%s1413_s21 + $0x10] sm:$0xff]  ;;  %v1425_v35 = vld [vmem:[%s1413_s21 + $0x18] sm:$0xff] }
   0xe   : > { %2137 = vst [vmem:[#allocation14_spill] sm:$0xff] %v1132_v12  ;;  %2138 = vst [vmem:[#allocation15_spill] sm:$0xff] %v1136_v13  ;;  %v1428_v36 = vld [vmem:[%s1413_s21 + $0x180] sm:$0xff]  ;;  %v1434_v38 = vld [vmem:[%s1413_s21 + $0x28] sm:$0xff] }
   0xf   : > { %2139 = vst [vmem:[#allocation16_spill] sm:$0xff] %v1140_v14  ;;  %2140 = vst [vmem:[#allocation17_spill] sm:$0xff] %v1144_v15  ;;  %v1431_v37 = vld [vmem:[%s1413_s21 + $0x20] sm:$0xff]  ;;  %v1437_v39 = vld [vmem:[%s1413_s21 + $0x30] sm:$0xff]  ;;  %v107_v51 = vadd.f32 %v1428_v36, %v1416_v32 }
  0x10   : > { %2141 = vst [vmem:[#allocation18_spill] sm:$0xff] %v1428_v36  ;;  %v1440_v40 = vld [vmem:[%s1413_s21 + $0x38] sm:$0xff]  ;;  %v1443_v41 = vld [vmem:[%s1413_s21 + $0x188] sm:$0xff]  ;;  %v1446_v42 = vld [vmem:[%s1413_s21 + $0x190] sm:$0xff] }
  0x11   : > { %2142 = vst [vmem:[#allocation19_spill] sm:$0xff] %v1443_v41  ;;  %2143 = vst [vmem:[#allocation20_spill] sm:$0xff] %v1446_v42  ;;  %v1449_v43 = vld [vmem:[%s1413_s21 + $0x198] sm:$0xff]  ;;  %v1452_v44 = vld [vmem:[%s1413_s21 + $0x1a0] sm:$0xff]  ;;  %v109_v52 = vadd.f32 %v1443_v41, %v1419_v33  ;;  %v111_v53 = vadd.f32 %v1446_v42, %v1422_v34 }
  0x12   : > { %2144 = vst [vmem:[#allocation21_spill] sm:$0xff] %v1449_v43  ;;  %2145 = vst [vmem:[#allocation22_spill] sm:$0xff] %v1452_v44  ;;  %v1455_v45 = vld [vmem:[%s1413_s21 + $0x1a8] sm:$0xff]  ;;  %v1458_v46 = vld [vmem:[%s1413_s21 + $0x1b0] sm:$0xff]  ;;  %v113_v54 = vadd.f32 %v1449_v43, %v1425_v35  ;;  %v115_v0 = vadd.f32 %v1452_v44, %v1431_v37 }
  0x13   : > { %2146 = vst [vmem:[#allocation23_spill] sm:$0xff] %v1455_v45  ;;  %2147 = vst [vmem:[#allocation24_spill] sm:$0xff] %v1458_v46  ;;  %v1461_v47 = vld [vmem:[%s1413_s21 + $0xc0] sm:$0xff]  ;;  %v1464_v48 = vld [vmem:[%s1413_s21 + $0x1b8] sm:$0xff]  ;;  %v117_v1 = vadd.f32 %v1455_v45, %v1434_v38  ;;  %v119_v2 = vadd.f32 %v1458_v46, %v1437_v39 }
  0x14   : > { %2148 = vst [vmem:[#allocation25_spill] sm:$0xff] %v1464_v48  ;;  %v1467_v49 = vld [vmem:[%s1413_s21 + $0x240] sm:$0xff]  ;;  %v1481_v55 = vld [vmem:[%s1413_s21 + $0xc8] sm:$0xff]  ;;  %v1484_v56 = vld [vmem:[%s1413_s21 + $0xd0] sm:$0xff]  ;;  %v121_v3 = vadd.f32 %v1464_v48, %v1440_v40 }
  0x15   : > { %2149 = vst [vmem:[#allocation26_spill] sm:$0xff] %v1467_v49  ;;  %v1470_v50 = vld [vmem:[%s1413_s21 + $0x300] sm:$0xff]  ;;  %v1487_v57 = vld [vmem:[%s1413_s21 + $0xd8] sm:$0xff]  ;;  %v1490_v58 = vld [vmem:[%s1413_s21 + $0x248] sm:$0xff] }
  0x16   : > { %2150 = vst [vmem:[#allocation27_spill] sm:$0xff] %v1470_v50  ;;  %2151 = vst [vmem:[#allocation28_spill] sm:$0xff] %v1487_v57  ;;  %v1493_v59 = vld [vmem:[%s1413_s21 + $0x250] sm:$0xff]  ;;  %v1496_v60 = vld [vmem:[%s1413_s21 + $0x258] sm:$0xff]  ;;  %v108_v10 = vadd.f32 %v107_v51, %v1470_v50 }
  0x17   : > { %2152 = vst [vmem:[#allocation29_spill] sm:$0xff] %v1490_v58  ;;  %2153 = vst [vmem:[#allocation30_spill] sm:$0xff] %v1493_v59  ;;  %v1499_v61 = vld [vmem:[%s1413_s21 + $0x308] sm:$0xff]  ;;  %v1502_v62 = vld [vmem:[%s1413_s21 + $0x310] sm:$0xff] }
  0x18   : > { %2154 = vst [vmem:[#allocation31_spill] sm:$0xff] %v1496_v60  ;;  %2155 = vst [vmem:[#allocation32_spill] sm:$0xff] %v1499_v61  ;;  %v1505_v63 = vld [vmem:[%s1413_s21 + $0x318] sm:$0xff]  ;;  %v1516_v4 = vld [vmem:[%s1413_s21 + $0xe0] sm:$0xff]  ;;  %v110_v11 = vadd.f32 %v109_v52, %v1499_v61  ;;  %v112_v12 = vadd.f32 %v111_v53, %v1502_v62  ;;  %v123_v53 = vadd.f32 %v1467_v49, %v1461_v47 }
  0x19   : > { %2156 = vst [vmem:[#allocation33_spill] sm:$0xff] %v1502_v62  ;;  %2157 = vst [vmem:[#allocation34_spill] sm:$0xff] %v1505_v63  ;;  %v1519_v5 = vld [vmem:[%s1413_s21 + $0xe8] sm:$0xff]  ;;  %v1522_v6 = vld [vmem:[%s1413_s21 + $0xf0] sm:$0xff]  ;;  %v114_v13 = vadd.f32 %v113_v54, %v1505_v63  ;;  %v1607_v31 = vadd.f32 %v1208_v31, %v108_v10   ;;  %v155_v10 = vmul.f32 %v1416_v32, %v1416_v32 }
  0x1a   : > { %v1525_v7 = vld [vmem:[%s1413_s21 + $0x320] sm:$0xff]  ;;  %v1528_v8 = vld [vmem:[%s1413_s21 + $0x328] sm:$0xff]  ;;  %v1531_v9 = vld [vmem:[%s1413_s21 + $0x330] sm:$0xff]  ;;  %v1611_v30 = vadd.f32 %v1204_v30, %v110_v11   ;;  %v1614_v29 = vadd.f32 %v1200_v29, %v112_v12   ;;  %v156_v11 = vmul.f32 %v1419_v33, %v1419_v33  ;;  %v157_v12 = vmul.f32 %v1422_v34, %v1422_v34 }
  0x1b   : > { %2158 = vst [vmem:[#allocation35_spill] sm:$0xff] %v1525_v7  ;;  %2159 = vst [vmem:[#allocation36_spill] sm:$0xff] %v1528_v8  ;;  %v1538_v14 = vld [vmem:[%s1413_s21 + $0xf8] sm:$0xff]  ;;  %v1541_v15 = vld [vmem:[%s1413_s21 + $0x260] sm:$0xff]  ;;  %v116_v45 = vadd.f32 %v115_v0, %v1525_v7  ;;  %v118_v51 = vadd.f32 %v117_v1, %v1528_v8  ;;  %v120_v52 = vadd.f32 %v119_v2, %v1531_v9 }
  0x1c   : > { %2160 = vst [vmem:[#allocation37_spill] sm:$0xff] %v1531_v9  ;;  %2161 = vst [vmem:[#allocation38_spill] sm:$0xff] %v1541_v15  ;;  %v1544_v48 = vld [vmem:[%s1413_s21 + $0x268] sm:$0xff]  ;;  %v1547_v46 = vld [vmem:[%s1413_s21 + $0x338] sm:$0xff]  ;;  %v125_v0 = vadd.f32 %v1490_v58, %v1481_v55  ;;  %v127_v1 = vadd.f32 %v1493_v59, %v1484_v56  ;;  %v129_v2 = vadd.f32 %v1496_v60, %v1487_v57 }
  0x1d   : > { %2162 = vst [vmem:[#allocation39_spill] sm:$0xff] %v1544_v48  ;;  %2163 = vst [vmem:[#allocation40_spill] sm:$0xff] %v1547_v46  ;;  %v1555_v54 = vld [vmem:[%s1413_s21 + $0x270] sm:$0xff]  ;;  %v1558_v63 = vld [vmem:[%s1413_s21 + $0x278] sm:$0xff]  ;;  %v122_v61 = vadd.f32 %v121_v3, %v1547_v46  ;;  %v131_v3 = vadd.f32 %v1541_v15, %v1516_v4  ;;  %v133_v46 = vadd.f32 %v1544_v48, %v1519_v5 }
  0x1e   : > { %2164 = vst [vmem:[#allocation41_spill] sm:$0xff] %v1555_v54  ;;  %2165 = vst [vmem:[#allocation42_spill] sm:$0xff] %v1558_v63  ;;  %v1561_v62 = vld [vmem:[%s1413_s21 + $0x3c0] sm:$0xff]  ;;  %v1571_v9 = vld [vmem:[%s1413_s21 + $0x3c8] sm:$0xff]  ;;  %v135_v59 = vadd.f32 %v1555_v54, %v1522_v6  ;;  %v1617_v28 = vadd.f32 %v1196_v28, %v114_v13   ;;  %v1620_v27 = vadd.f32 %v1192_v27, %v116_v45  }
  0x1f   : > { %2166 = vst [vmem:[#allocation43_spill] sm:$0xff] %v1561_v62  ;;  %v1574_v8 = vld [vmem:[%s1413_s21 + $0x3d0] sm:$0xff]  ;;  %v1577_v7 = vld [vmem:[%s1413_s21 + $0x3d8] sm:$0xff]  ;;  %v124_v50 = vadd.f32 %v123_v53, %v1561_v62  ;;  %v1587_v58 = vld [vmem:[%s1413_s21 + $0x3e0] sm:$0xff]  ;;  %v126_v44 = vadd.f32 %v125_v0, %v1571_v9  ;;  %v137_v62 = vadd.f32 %v1558_v63, %v1538_v14  ;;  %v1623_v26 = vadd.f32 %v1188_v26, %v118_v51  }
  0x20   : > { %2167 = vst [vmem:[#allocation44_spill] sm:$0xff] %v1587_v58  ;;  %v1590_v60 = vld [vmem:[%s1413_s21 + $0x3e8] sm:$0xff]  ;;  %v1593_v49 = vld [vmem:[%s1413_s21 + $0x3f0] sm:$0xff]  ;;  %v128_v43 = vadd.f32 %v127_v1, %v1574_v8  ;;  %v130_v53 = vadd.f32 %v129_v2, %v1577_v7  ;;  %v1601_v15 = vld [vmem:[%s1413_s21 + $0x3f8] sm:$0xff]  ;;  %v132_v48 = vadd.f32 %v131_v3, %v1587_v58  ;;  %v1626_v25 = vadd.f32 %v1184_v25, %v120_v52  }
  0x21   : > { %v134_v54 = vadd.f32 %v133_v46, %v1590_v60  ;;  %v136_v42 = vadd.f32 %v135_v59, %v1593_v49  ;;  %2168 = vst [vmem:[#allocation45_spill] sm:$0xff] %v1607_v31  ;;  %v138_v0 = vadd.f32 %v137_v62, %v1601_v15  ;;  %2169 = vst [vmem:[#allocation46_spill] sm:$0xff] %v1611_v30  ;;  %v2186_v31 = vmov %v1443_v41  ;;  %v2187_v33 = vld [vmem:[#allocation20_spill] sm:$0xff] }
  0x22   : > { %2170 = vst [vmem:[#allocation47_spill] sm:$0xff] %v1614_v29  ;;  %2171 = vst [vmem:[#allocation48_spill] sm:$0xff] %v1617_v28  ;;  %v1629_v24 = vadd.f32 %v1180_v24, %v122_v61   ;;  %v1632_v23 = vadd.f32 %v1176_v23, %v124_v50   ;;  %v1635_v22 = vadd.f32 %v1172_v22, %v126_v44   ;;  %v2185_v29 = vmov %v1428_v36 }
  0x23   : > { %2172 = vst [vmem:[#allocation49_spill] sm:$0xff] %v1620_v27  ;;  %2173 = vst [vmem:[#allocation50_spill] sm:$0xff] %v1623_v26  ;;  %v1638_v21 = vadd.f32 %v1168_v21, %v128_v43   ;;  %v1641_v20 = vadd.f32 %v1164_v20, %v130_v53   ;;  %v1644_v19 = vadd.f32 %v1160_v19, %v132_v48   ;;  %v2193_v43 = vld [vmem:[#allocation26_spill] sm:$0xff] }
  0x24   : > { %2174 = vst [vmem:[#allocation51_spill] sm:$0xff] %v1626_v25  ;;  %2175 = vst [vmem:[#allocation52_spill] sm:$0xff] %v1629_v24  ;;  %v1647_v18 = vadd.f32 %v1156_v18, %v134_v54   ;;  %v1650_v17 = vadd.f32 %v1152_v17, %v136_v42   ;;  %v1653_v16 = vadd.f32 %v1148_v16, %v138_v0   ;;  %v2196_v54 = vld [vmem:[#allocation31_spill] sm:$0xff]  ;;  %v2197_v2 = vld [vmem:[#allocation38_spill] sm:$0xff] }
  0x25   : > { %2176 = vst [vmem:[#allocation53_spill] sm:$0xff] %v1632_v23  ;;  %2177 = vst [vmem:[#allocation54_spill] sm:$0xff] %v1635_v22  ;;  %v158_v13 = vmul.f32 %v1425_v35, %v1425_v35  ;;  %v165_v22 = vmul.f32 %v1484_v56, %v1484_v56  ;;  %v2184_v23 = vmov %v1487_v57  ;;  %v167_v25 = vmul.f32 %v1516_v4, %v1516_v4  ;;  %v2188_v35 = vld [vmem:[#allocation21_spill] sm:$0xff]  ;;  %v2198_v53 = vld [vmem:[#allocation39_spill] sm:$0xff] }
  0x26   : > { %2178 = vst [vmem:[#allocation55_spill] sm:$0xff] %v1638_v21  ;;  %2179 = vst [vmem:[#allocation56_spill] sm:$0xff] %v1641_v20  ;;  %v163_v20 = vmul.f32 %v1461_v47, %v1461_v47  ;;  %v164_v21 = vmul.f32 %v1481_v55, %v1481_v55  ;;  %v166_v24 = vmul.f32 %v2184_v23, %v2184_v23  ;;  %v2194_v47 = vld [vmem:[#allocation29_spill] sm:$0xff]  ;;  %v2195_v55 = vld [vmem:[#allocation30_spill] sm:$0xff] }
  0x27   : > { %2180 = vst [vmem:[#allocation57_spill] sm:$0xff] %v1644_v19  ;;  %2181 = vst [vmem:[#allocation58_spill] sm:$0xff] %v1647_v18  ;;  %v159_v18 = vmul.f32 %v1431_v37, %v1431_v37  ;;  %v162_v19 = vmul.f32 %v1440_v40, %v1440_v40  ;;  %v168_v26 = vmul.f32 %v1519_v5, %v1519_v5  ;;  %v2189_v37 = vld [vmem:[#allocation22_spill] sm:$0xff]  ;;  %v2192_v40 = vld [vmem:[#allocation25_spill] sm:$0xff] }
  0x28   : > { %2182 = vst [vmem:[#allocation59_spill] sm:$0xff] %v1650_v17  ;;  %2183 = vst [vmem:[#allocation60_spill] sm:$0xff] %v1653_v16  ;;  %v160_v17 = vmul.f32 %v1434_v38, %v1434_v38  ;;  %v161_v16 = vmul.f32 %v1437_v39, %v1437_v39  ;;  %v169_v27 = vmul.f32 %v1522_v6, %v1522_v6  ;;  %v2190_v38 = vld [vmem:[#allocation23_spill] sm:$0xff]  ;;  %v2191_v39 = vld [vmem:[#allocation24_spill] sm:$0xff] }
  0x29   : > { %v170_v28 = vmul.f32 %v1538_v14, %v1538_v14  ;;  %v171_v30 = vmul.f32 %v2185_v29, %v2185_v29  ;;  %v172_v32 = vmul.f32 %v2186_v31, %v2186_v31  ;;  %v173_v34 = vmul.f32 %v2187_v33, %v2187_v33  ;;  %v2199_v23 = vld [vmem:[#allocation41_spill] sm:$0xff]  ;;  %v2208_v58 = vld [vmem:[#allocation40_spill] sm:$0xff]  ;;  %v2209_v46 = vld [vmem:[#allocation43_spill] sm:$0xff] }
  0x2a   : > { %v174_v4 = vmul.f32 %v2188_v35, %v2188_v35  ;;  %v175_v5 = vmul.f32 %v2189_v37, %v2189_v37  ;;  %v176_v6 = vmul.f32 %v2190_v38, %v2190_v38  ;;  %v177_v14 = vmul.f32 %v2191_v39, %v2191_v39  ;;  %v2201_v35 = vld [vmem:[#allocation27_spill] sm:$0xff]  ;;  %v2202_v38 = vld [vmem:[#allocation32_spill] sm:$0xff] }
  0x2b   : > { %v178_v42 = vmul.f32 %v2192_v40, %v2192_v40  ;;  %v179_v44 = vmul.f32 %v2193_v43, %v2193_v43  ;;  %v180_v48 = vmul.f32 %v2194_v47, %v2194_v47  ;;  %v181_v56 = vmul.f32 %v2195_v55, %v2195_v55  ;;  %v2203_v40 = vld [vmem:[#allocation33_spill] sm:$0xff]  ;;  %v2204_v47 = vld [vmem:[#allocation34_spill] sm:$0xff]  ;;  %v2210_v59 = vld [vmem:[#allocation44_spill] sm:$0xff] }
  0x2c   : > { %v182_v1 = vmul.f32 %v2196_v54, %v2196_v54  ;;  %v183_v3 = vmul.f32 %v2197_v2, %v2197_v2  ;;  %v184_v0 = vmul.f32 %v2198_v53, %v2198_v53  ;;  %v185_v29 = vmul.f32 %v2199_v23, %v2199_v23  ;;  %v2205_v54 = vld [vmem:[#allocation35_spill] sm:$0xff]  ;;  %v2206_v53 = vld [vmem:[#allocation36_spill] sm:$0xff] }
  0x2d   : > { %v2200_v31 = vmov %v1558_v63  ;;  %v187_v37 = vmul.f32 %v2201_v35, %v2201_v35  ;;  %v188_v39 = vmul.f32 %v2202_v38, %v2202_v38  ;;  %v189_v43 = vmul.f32 %v2203_v40, %v2203_v40  ;;  %v2207_v63 = vld [vmem:[#allocation37_spill] sm:$0xff] }
  0x2e   : > { %v186_v33 = vmul.f32 %v2200_v31, %v2200_v31  ;;  %v190_v55 = vmul.f32 %v2204_v47, %v2204_v47  ;;  %v191_v2 = vmul.f32 %v2205_v54, %v2205_v54  ;;  %v192_v23 = vmul.f32 %v2206_v53, %v2206_v53 }
  0x2f   : > { %v193_v31 = vmul.f32 %v2207_v63, %v2207_v63  ;;  %v194_v35 = vmul.f32 %v2208_v58, %v2208_v58  ;;  %v195_v38 = vmul.f32 %v2209_v46, %v2209_v46  ;;  %v196_v40 = vmul.f32 %v1571_v9, %v1571_v9 }
  0x30   : > { %v197_v47 = vmul.f32 %v1574_v8, %v1574_v8  ;;  %v198_v54 = vmul.f32 %v1577_v7, %v1577_v7  ;;  %v199_v53 = vmul.f32 %v2210_v59, %v2210_v59  ;;  %v200_v63 = vmul.f32 %v1590_v60, %v1590_v60 }
  0x31   : > { %v201_v58 = vmul.f32 %v1593_v49, %v1593_v49  ;;  %v202_v46 = vmul.f32 %v1601_v15, %v1601_v15  ;;  %v203_v62 = vadd.f32 %v171_v30, %v155_v10  ;;  %v205_v9 = vadd.f32 %v172_v32, %v156_v11 }
  0x32   : > { %v207_v41 = vadd.f32 %v173_v34, %v157_v12  ;;  %v209_v36 = vadd.f32 %v174_v4, %v158_v13  ;;  %v211_v8 = vadd.f32 %v175_v5, %v159_v18  ;;  %v213_v57 = vadd.f32 %v176_v6, %v160_v17  ;;  %v2211_v6 = vld [vmem:[#allocation17_spill] sm:$0xff] }
  0x33   : > { %v215_v45 = vadd.f32 %v177_v14, %v161_v16  ;;  %v217_v7 = vadd.f32 %v178_v42, %v162_v19  ;;  %v204_v51 = vadd.f32 %v203_v62, %v187_v37  ;;  %v206_v52 = vadd.f32 %v205_v9, %v188_v39  ;;  %v2230_v14 = vld [vmem:[#allocation3_spill] sm:$0xff] }
  0x34   : > { %v208_v59 = vadd.f32 %v207_v41, %v189_v43  ;;  %v210_v61 = vadd.f32 %v209_v36, %v190_v55  ;;  %v212_v50 = vadd.f32 %v211_v8, %v191_v2  ;;  %v214_v60 = vadd.f32 %v213_v57, %v192_v23  ;;  %v2261_v23 = vld [vmem:[#allocation53_spill] sm:$0xff] }
  0x35   : > { %v216_v49 = vadd.f32 %v215_v45, %v193_v31  ;;  %v218_v15 = vadd.f32 %v217_v7, %v194_v35  ;;  %v219_v10 = vadd.f32 %v179_v44, %v163_v20  ;;  %v221_v30 = vadd.f32 %v180_v48, %v164_v21  ;;  %v2212_v45 = vld [vmem:[#allocation16_spill] sm:$0xff]  ;;  %v2213_v20 = vld [vmem:[#allocation15_spill] sm:$0xff]  ;;  %v2214_v21 = vld [vmem:[#allocation14_spill] sm:$0xff] }
  0x36   : > { %v223_v11 = vadd.f32 %v181_v56, %v165_v22  ;;  %v225_v32 = vadd.f32 %v182_v1, %v166_v24  ;;  %v227_v12 = vadd.f32 %v183_v3, %v167_v25  ;;  %v229_v34 = vadd.f32 %v184_v0, %v168_v26  ;;  %v2215_v22 = vld [vmem:[#allocation13_spill] sm:$0xff]  ;;  %v2216_v24 = vld [vmem:[#allocation12_spill] sm:$0xff]  ;;  %v2218_v25 = vld [vmem:[#allocation11_spill] sm:$0xff] }
  0x37   : > { %v231_v4 = vadd.f32 %v185_v29, %v169_v27  ;;  %v233_v13 = vadd.f32 %v186_v33, %v170_v28  ;;  %v220_v18 = vadd.f32 %v219_v10, %v195_v38  ;;  %v222_v17 = vadd.f32 %v221_v30, %v196_v40  ;;  %v2221_v26 = vld [vmem:[#allocation10_spill] sm:$0xff]  ;;  %v2224_v27 = vld [vmem:[#allocation9_spill] sm:$0xff]  ;;  %v2268_v30 = vld [vmem:[#allocation46_spill] sm:$0xff] }
  0x38   : > { %v224_v16 = vadd.f32 %v223_v11, %v197_v47  ;;  %v226_v19 = vadd.f32 %v225_v32, %v198_v54  ;;  %v228_v62 = vadd.f32 %v227_v12, %v199_v53  ;;  %v230_v5 = vadd.f32 %v229_v34, %v200_v63  ;;  %v2227_v28 = vld [vmem:[#allocation6_spill] sm:$0xff]  ;;  %v2267_v29 = vld [vmem:[#allocation47_spill] sm:$0xff]  ;;  %v2269_v31 = vld [vmem:[#allocation45_spill] sm:$0xff] }
  0x39   : > { %v232_v41 = vadd.f32 %v231_v4, %v201_v58  ;;  %v234_v36 = vadd.f32 %v233_v13, %v202_v46  ;;  %v235_v57 = vadd.f32 %v2211_v6, %v204_v51   ;;  %v236_v42 = vadd.f32 %v2212_v45, %v206_v52   ;;  %v2225_v51 = vld [vmem:[#allocation8_spill] sm:$0xff]  ;;  %v2226_v52 = vld [vmem:[#allocation7_spill] sm:$0xff]  ;;  %v2231_v1 = vld [vmem:[#allocation2_spill] sm:$0xff] }
  0x3a   : > { %v237_v44 = vadd.f32 %v2213_v20, %v208_v59   ;;  %v238_v48 = vadd.f32 %v2214_v21, %v210_v61   ;;  %v239_v56 = vadd.f32 %v2215_v22, %v212_v50   ;;  %v1757_v10 = vadd.f32 %v2216_v24, %v214_v60   ;;  %v2228_v61 = vld [vmem:[#allocation5_spill] sm:$0xff]  ;;  %v2229_v50 = vld [vmem:[#allocation4_spill] sm:$0xff]  ;;  %v2258_v20 = vld [vmem:[#allocation56_spill] sm:$0xff] }
  0x3b   : > { %v1760_v9 = vadd.f32 %v2218_v25, %v216_v49   ;;  %v1763_v8 = vadd.f32 %v2221_v26, %v218_v15   ;;  %v243_v43 = vadd.f32 %v2224_v27, %v220_v18   ;;  %v244_v55 = vadd.f32 %v2225_v51, %v222_v17   ;;  %v2255_v17 = vld [vmem:[#allocation59_spill] sm:$0xff]  ;;  %v2256_v18 = vld [vmem:[#allocation58_spill] sm:$0xff]  ;;  %v2262_v24 = vld [vmem:[#allocation52_spill] sm:$0xff] }
  0x3c   : > { %v2217_v33 = vmov %v1757_v10  ;;  %v245_v35 = vadd.f32 %v2226_v52, %v224_v16   ;;  %v246_v38 = vadd.f32 %v2227_v28, %v226_v19   ;;  %v247_v40 = vadd.f32 %v2228_v61, %v228_v62   ;;  %v2254_v16 = vld [vmem:[#allocation60_spill] sm:$0xff]  ;;  %v2257_v19 = vld [vmem:[#allocation57_spill] sm:$0xff]  ;;  %v2259_v21 = vld [vmem:[#allocation55_spill] sm:$0xff]  ;;  %20 = sbr.rel (!%p1778_p0) target bundleno = 8 (0x8), region = 57 }
  0x3d   : > { %2219 = vst [vmem:[#allocation61_spill] sm:$0xff] %v1760_v9  ;;  %2222 = vst [vmem:[#allocation62_spill] sm:$0xff] %v1763_v8  ;;  %v248_v47 = vadd.f32 %v2229_v50, %v230_v5   ;;  %v249_v54 = vadd.f32 %v2230_v14, %v232_v41   ;;  %v1773_v0 = vadd.f32 %v2231_v1, %v234_v36   ;;  %v2242_v6 = vmov %v244_v55  ;;  %v2260_v22 = vld [vmem:[#allocation54_spill] sm:$0xff]  ;;  %v2263_v25 = vld [vmem:[#allocation51_spill] sm:$0xff] }
  0x3e   : > { %v2239_v3 = vmov %v247_v40  ;;  %v2240_v4 = vmov %v246_v38  ;;  %v2241_v5 = vmov %v245_v35  ;;  %v2243_v7 = vmov %v243_v43  ;;  %v2264_v26 = vld [vmem:[#allocation50_spill] sm:$0xff]  ;;  %v2265_v27 = vld [vmem:[#allocation49_spill] sm:$0xff]  ;;  %v2266_v28 = vld [vmem:[#allocation48_spill] sm:$0xff] }
  0x3f   : > { %2232 = vst [vmem:[#allocation63_spill] sm:$0xff] %v1773_v0  ;;  %v2235_v53 = vmov %v1773_v0  ;;  %v2237_v1 = vmov %v249_v54  ;;  %v2238_v2 = vmov %v248_v47  ;;  %v2244_v39 = vmov %v1763_v8  ;;  %v2271_v63 = vld [vmem:[#allocation45_spill] sm:$0xff] (%p1778_p0)  ;;  %v2272_v58 = vld [vmem:[#allocation46_spill] sm:$0xff] (%p1778_p0)  ;;  %v2275_v62 = vld [vmem:[#allocation47_spill] sm:$0xff] (%p1778_p0) }
  0x40   : > { %v2236_v0 = vmov %v2235_v53  ;;  %v2245_v8 = vmov %v2244_v39  ;;  %v2246_v37 = vmov %v1760_v9  ;;  %v2248_v10 = vmov %v2217_v33  ;;  %v2273_v60 = vld [vmem:[#allocation53_spill] sm:$0xff] (%p1778_p0)  ;;  %v2274_v49 = vld [vmem:[#allocation54_spill] sm:$0xff] (%p1778_p0)  ;;  %v2276_v45 = vld [vmem:[#allocation55_spill] sm:$0xff] (%p1778_p0) }
  0x41   : > { %v2247_v9 = vmov %v2246_v37  ;;  %v2249_v11 = vmov %v239_v56  ;;  %v2250_v12 = vmov %v238_v48  ;;  %v2251_v13 = vmov %v237_v44  ;;  %v2277_v31 = vld [vmem:[#allocation48_spill] sm:$0xff] (%p1778_p0)  ;;  %v2279_v3 = vld [vmem:[#allocation49_spill] sm:$0xff] (%p1778_p0)  ;;  %v2281_v8 = vld [vmem:[#allocation50_spill] sm:$0xff] (%p1778_p0) }
  0x42   : > { %v2252_v14 = vmov %v236_v42  ;;  %v2253_v15 = vmov %v235_v57  ;;  %v251_v46 = vadd.f32 (%p1778_p0), %v2272_v58, %v2271_v63  ;;  %v269_v59 = vadd.f32 (%p1778_p0), %v236_v42, %v235_v57  ;;  %v2278_v53 = vld [vmem:[#allocation56_spill] sm:$0xff] (%p1778_p0)  ;;  %v2280_v2 = vld [vmem:[#allocation57_spill] sm:$0xff] (%p1778_p0)  ;;  %v2282_v10 = vld [vmem:[#allocation58_spill] sm:$0xff] (%p1778_p0) }
  0x43   :  { %v260_v32 = vadd.f32 %v2274_v49, %v2273_v60  ;;  %v278_v34 = vadd.f32 %v244_v55, %v243_v43  ;;  %v2283_v12 = vld [vmem:[#allocation51_spill] sm:$0xff]  ;;  %v2286_v5 = vld [vmem:[#allocation52_spill] sm:$0xff] }
  0x44   :  { %v252_v41 = vadd.f32 %v251_v46, %v2275_v62  ;;  %v270_v36 = vadd.f32 %v269_v59, %v237_v44  ;;  %v2284_v13 = vld [vmem:[#allocation61_spill] sm:$0xff]  ;;  %v2285_v17 = vld [vmem:[#allocation59_spill] sm:$0xff]  ;;  %v2287_v57 = vld [vmem:[#allocation62_spill] sm:$0xff] }
  0x45   :  { %v261_v51 = vadd.f32 %v260_v32, %v2276_v45  ;;  %v279_v52 = vadd.f32 %v278_v34, %v245_v35  ;;  %v2288_v20 = vld [vmem:[#allocation60_spill] sm:$0xff]  ;;  %v297_v14 = vld [vmem:[%s2091_s1] sm:$0xff] }
  0x46   :  { %v253_v61 = vadd.f32 %v252_v41, %v2277_v31  ;;  %v271_v50 = vadd.f32 %v270_v36, %v238_v48  ;;  %v2289_v21 = vld [vmem:[#allocation63_spill] sm:$0xff]  ;;  %v298_v63 = vld [vmem:[%s2091_s1 + $0x8] sm:$0xff]  ;;  %s1934_s1 = smov 0  }
  0x47   :  { %v262_v39 = vadd.f32 %v261_v51, %v2278_v53  ;;  %v280_v37 = vadd.f32 %v279_v52, %v246_v38  ;;  %v1912_v53 = vld [vmem:[%s2092_s2] sm:$0xff]  ;;  %v1927_v49 = vld [vmem:[%s2092_s2 + $0x8] sm:$0xff] }
  0x48   :  { %v254_v0 = vadd.f32 %v253_v61, %v2279_v3  ;;  %v272_v29 = vadd.f32 %v271_v50, %v239_v56 }
  0x49   :  { %v263_v23 = vadd.f32 %v262_v39, %v2280_v2  ;;  %v281_v9 = vadd.f32 %v280_v37, %v247_v40 }
  0x4a   :  { %v255_v7 = vadd.f32 %v254_v0, %v2281_v8  ;;  %v273_v15 = vadd.f32 %v272_v29, %v2217_v33 }
  0x4b   :  { %v264_v30 = vadd.f32 %v263_v23, %v2282_v10  ;;  %v282_v11 = vadd.f32 %v281_v9, %v248_v47 }
  0x4c   :  { %v256_v4 = vadd.f32 %v255_v7, %v2283_v12  ;;  %v274_v18 = vadd.f32 %v273_v15, %v2284_v13 }
  0x4d   :  { %v265_v16 = vadd.f32 %v264_v30, %v2285_v17  ;;  %v283_v19 = vadd.f32 %v282_v11, %v249_v54 }
  0x4e   :  { %v257_v6 = vadd.f32 %v256_v4, %v2286_v5  ;;  %v275_v42 = vadd.f32 %v274_v18, %v2287_v57 }
  0x4f   :  { %v266_v44 = vadd.f32 %v265_v16, %v2288_v20  ;;  %v284_v48 = vadd.f32 %v283_v19, %v2289_v21 }
  0x50   :  { %258 = vadd.xlane.f32.xlu0 %v257_v6  ;;  %276 = vadd.xlane.f32.xlu1 %v275_v42 }
  0x54   :  { %267 = vadd.xlane.f32.xlu0 %v266_v44  ;;  %285 = vadd.xlane.f32.xlu1 %v284_v48 }
  0xdd   :  { %v259_v22 = vpop.xlane.xlu0 %258  ;;  %v277_v56 = vpop.xlane.xlu1 %276 }
  0xde   :  { %v287_v24 = vmul.f32 0.000108506945, %v259_v22  ;;  %v289_v33 = vmul.f32 0.000108506945, %v277_v56 }
  0xe0   :  { %312 = vst.msk [vmem:[%s2094_s4] sm:$0xff] %vm311_vm0, %v287_v24  ;;  %v291_v25 = vmul.f32 %v287_v24, %v287_v24 }
  0xe1   :  { %v268_v37 = vpop.xlane.xlu0 %267  ;;  %v286_v26 = vpop.xlane.xlu1 %285 }
  0xe2   :  { %v293_v39 = vsub.f32 %v289_v33, %v291_v25  ;;  %v288_v27 = vmul.f32 0.000108506945, %v268_v37  ;;  %v290_v43 = vmul.f32 0.000108506945, %v286_v26 }
  0xe4   :  { %v295_v55 = vmax.f32 %v293_v39, 0.0  ;;  %313 = vst.msk [vmem:[%s2094_s4 + $0x8] sm:$0xff] %vm311_vm0, %v288_v27  ;;  %v292_v35 = vmul.f32 %v288_v27, %v288_v27 }
  0xe6   :  { %v299_v28 = vadd.f32 1e-05, %v295_v55  ;;  %315 = vst.msk [vmem:[%s2094_s4] sm:$0xff] %vm314_vm1, %v295_v55  ;;  %v294_v38 = vsub.f32 %v290_v43, %v292_v35 }
  0xe8   :  { %940 = vrsqrt.f32 %v299_v28  ;;  %v296_v40 = vmax.f32 %v294_v38, 0.0 }
  0xea   :  { %v300_v47 = vadd.f32 1e-05, %v296_v40  ;;  %316 = vst.msk [vmem:[%s2094_s4 + $0x8] sm:$0xff] %vm314_vm1, %v296_v40 }
  0xec   :  { %942 = vrsqrt.f32 %v300_v47 }
  0xf2   :  { %v941_v54 = vpop.eup %940 }
  0xf3   :  { %v1907_v1 = vmul.f32 %v941_v54, %v297_v14 }
  0xf5   :  { %v1918_v58 = vmul.f32 %v1907_v1, %v287_v24 }
  0xf6   :  { %v943_v46 = vpop.eup %942 }
  0xf7   :  { %v309_v59 = vsub.f32 %v1912_v53, %v1918_v58  ;;  %v1922_v60 = vmul.f32 %v943_v46, %v298_v63 }
  0xf9   :  { %v1930_v32 = vmul.f32 %v1922_v60, %v288_v27 }
  0xfb   :  { %v310_v34 = vsub.f32 %v1927_v49, %v1930_v32 }
  0xfc LB: > { %v1218_v62 = vmov 0   ;;  %s664_s2 = sshll.u32 %s1216_s1, 10  ;;  %s322_s1 = sadd.s32 1, %s1216_s1   ;;  %s1216_s1 = sphi %s1934_s1, %s322_s1  }
  0xfd   : > { %945 = vset.pattern.permute.xlu1 %v1218_v62  ;;  %944 = vset.pattern.permute.xlu0 %v1218_v62  ;;  %s1948_s13 = sshra.s32 %s664_s2, 7  ;;  %p319_p1 = scmp.ge.s32.totalorder %s322_s1, 3  }
  0xfe   : > { %436 = vperm.xlu1 %945, %v309_v59   ;;  %378 = vperm.xlu0 %944, %v1907_v1   ;;  %s665_s14 = sshll.u32 %s1948_s13, 3 }
  0xff   : > { %s1956_s17 = scalar_lea.vmem %s2090_s0, %s665_s14  ;;  %s1987_s20 = scalar_lea.vmem %s2093_s3, %s665_s14 }
 0x100   : > { %v328_v41 = vld [vmem:[%s1956_s17] sm:$0xff]  ;;  %v329_v36 = vld [vmem:[%s1956_s17 + $0x8] sm:$0xff]  ;;  %v330_v45 = vld [vmem:[%s1956_s17 + $0x10] sm:$0xff] }
 0x101   : > { %v331_v51 = vld [vmem:[%s1956_s17 + $0x18] sm:$0xff]  ;;  %v332_v52 = vld [vmem:[%s1956_s17 + $0x20] sm:$0xff]  ;;  %v333_v31 = vld [vmem:[%s1956_s17 + $0x28] sm:$0xff] }
 0x102   : > { %441 = vperm.xlu1 %945, %v310_v34   ;;  %383 = vperm.xlu0 %944, %v1922_v60   ;;  %v334_v61 = vld [vmem:[%s1956_s17 + $0x30] sm:$0xff]  ;;  %v335_v50 = vld [vmem:[%s1956_s17 + $0x38] sm:$0xff]  ;;  %v344_v3 = vld [vmem:[%s1956_s17 + $0x180] sm:$0xff] }
 0x103   : > { %v345_v0 = vld [vmem:[%s1956_s17 + $0x188] sm:$0xff]  ;;  %v346_v29 = vld [vmem:[%s1956_s17 + $0x190] sm:$0xff]  ;;  %v347_v2 = vld [vmem:[%s1956_s17 + $0x198] sm:$0xff] }
 0x104   : > { %v348_v9 = vld [vmem:[%s1956_s17 + $0x1a0] sm:$0xff]  ;;  %v349_v8 = vld [vmem:[%s1956_s17 + $0x1a8] sm:$0xff]  ;;  %v350_v7 = vld [vmem:[%s1956_s17 + $0x1b0] sm:$0xff] }
 0x105   : > { %v351_v15 = vld [vmem:[%s1956_s17 + $0x1b8] sm:$0xff]  ;;  %v360_v10 = vld [vmem:[%s1956_s17 + $0x300] sm:$0xff]  ;;  %v361_v30 = vld [vmem:[%s1956_s17 + $0x308] sm:$0xff] }
 0x106   : > { %v362_v18 = vld [vmem:[%s1956_s17 + $0x310] sm:$0xff]  ;;  %v363_v17 = vld [vmem:[%s1956_s17 + $0x318] sm:$0xff]  ;;  %v364_v16 = vld [vmem:[%s1956_s17 + $0x320] sm:$0xff] }
 0x107   : > { %v365_v42 = vld [vmem:[%s1956_s17 + $0x328] sm:$0xff]  ;;  %v366_v20 = vld [vmem:[%s1956_s17 + $0x330] sm:$0xff]  ;;  %v367_v44 = vld [vmem:[%s1956_s17 + $0x338] sm:$0xff] }
 0x17d   : > { %v379_v23 = vpop.permute.xlu0 %378  ;;  %v437_v55 = vpop.permute.xlu1 %436 }
 0x17e   : > { %v386_v11 = vmul.f32 %v379_v23, %v328_v41  ;;  %v387_v12 = vmul.f32 %v379_v23, %v329_v36  ;;  %v388_v4 = vmul.f32 %v379_v23, %v330_v45  ;;  %v389_v13 = vmul.f32 %v379_v23, %v331_v51  ;;  %v336_v45 = vld [vmem:[%s1956_s17 + $0xc0] sm:$0xff]  ;;  %v337_v51 = vld [vmem:[%s1956_s17 + $0xc8] sm:$0xff] }
 0x17f   : > { %v390_v19 = vmul.f32 %v379_v23, %v332_v52  ;;  %v391_v5 = vmul.f32 %v379_v23, %v333_v31  ;;  %v392_v6 = vmul.f32 %v379_v23, %v334_v61  ;;  %v393_v57 = vmul.f32 %v379_v23, %v335_v50  ;;  %v338_v52 = vld [vmem:[%s1956_s17 + $0xd0] sm:$0xff] }
 0x180   : > { %v402_v21 = vmul.f32 %v379_v23, %v344_v3  ;;  %v403_v48 = vmul.f32 %v379_v23, %v345_v0  ;;  %v404_v22 = vmul.f32 %v379_v23, %v346_v29  ;;  %v405_v56 = vmul.f32 %v379_v23, %v347_v2  ;;  %v339_v0 = vld [vmem:[%s1956_s17 + $0xd8] sm:$0xff]  ;;  %v340_v29 = vld [vmem:[%s1956_s17 + $0xe0] sm:$0xff]  ;;  %v341_v2 = vld [vmem:[%s1956_s17 + $0xe8] sm:$0xff] }
 0x181   : > { %v406_v24 = vmul.f32 %v379_v23, %v348_v9  ;;  %v407_v33 = vmul.f32 %v379_v23, %v349_v8  ;;  %v408_v25 = vmul.f32 %v379_v23, %v350_v7  ;;  %v409_v37 = vmul.f32 %v379_v23, %v351_v15  ;;  %v2003_v15 = vpop.permute.xlu0 %383 }
 0x182   : > { %v418_v26 = vmul.f32 %v379_v23, %v360_v10  ;;  %v419_v39 = vmul.f32 %v379_v23, %v361_v30  ;;  %v420_v27 = vmul.f32 %v379_v23, %v362_v18  ;;  %v421_v43 = vmul.f32 %v379_v23, %v363_v17  ;;  %v342_v10 = vld [vmem:[%s1956_s17 + $0xf0] sm:$0xff]  ;;  %v343_v30 = vld [vmem:[%s1956_s17 + $0xf8] sm:$0xff]  ;;  %v353_v17 = vld [vmem:[%s1956_s17 + $0x248] sm:$0xff] }
 0x183   : > { %v422_v35 = vmul.f32 %v379_v23, %v364_v16  ;;  %v423_v28 = vmul.f32 %v379_v23, %v365_v42  ;;  %v424_v38 = vmul.f32 %v379_v23, %v366_v20  ;;  %v425_v40 = vmul.f32 %v379_v23, %v367_v44  ;;  %v354_v16 = vld [vmem:[%s1956_s17 + $0x250] sm:$0xff]  ;;  %v356_v20 = vld [vmem:[%s1956_s17 + $0x260] sm:$0xff]  ;;  %v357_v44 = vld [vmem:[%s1956_s17 + $0x268] sm:$0xff] }
 0x184   : > { %v444_v47 = vadd.f32 %v437_v55, %v386_v11  ;;  %v445_v14 = vadd.f32 %v437_v55, %v387_v12  ;;  %v446_v54 = vadd.f32 %v437_v55, %v388_v4  ;;  %v447_v63 = vadd.f32 %v437_v55, %v389_v13  ;;  %v352_v11 = vld [vmem:[%s1956_s17 + $0x240] sm:$0xff] }
 0x185   : > { %v448_v46 = vadd.f32 %v437_v55, %v390_v19  ;;  %v449_v62 = vadd.f32 %v437_v55, %v391_v5  ;;  %v450_v41 = vadd.f32 %v437_v55, %v392_v6  ;;  %v451_v36 = vadd.f32 %v437_v55, %v393_v57  ;;  %v355_v19 = vld [vmem:[%s1956_s17 + $0x258] sm:$0xff] }
 0x186   : > { %v460_v31 = vadd.f32 %v437_v55, %v402_v21  ;;  %v461_v61 = vadd.f32 %v437_v55, %v403_v48  ;;  %v462_v50 = vadd.f32 %v437_v55, %v404_v22  ;;  %v463_v3 = vadd.f32 %v437_v55, %v405_v56  ;;  %494 = vst [vmem:[%s1987_s20] sm:$0xff] %v444_v47  ;;  %v358_v21 = vld [vmem:[%s1956_s17 + $0x270] sm:$0xff]  ;;  %v359_v48 = vld [vmem:[%s1956_s17 + $0x278] sm:$0xff]  ;;  %v368_v22 = vld [vmem:[%s1956_s17 + $0x3c0] sm:$0xff] }
 0x187   : > { %495 = vst [vmem:[%s1987_s20 + $0x8] sm:$0xff] %v445_v14  ;;  %496 = vst [vmem:[%s1987_s20 + $0x10] sm:$0xff] %v446_v54  ;;  %v464_v23 = vadd.f32 %v437_v55, %v406_v24  ;;  %v465_v9 = vadd.f32 %v437_v55, %v407_v33  ;;  %v466_v8 = vadd.f32 %v437_v55, %v408_v25  ;;  %v369_v56 = vld [vmem:[%s1956_s17 + $0x3c8] sm:$0xff]  ;;  %v375_v47 = vld [vmem:[%s1956_s17 + $0x3f8] sm:$0xff] }
 0x188   : > { %497 = vst [vmem:[%s1987_s20 + $0x18] sm:$0xff] %v447_v63  ;;  %v467_v7 = vadd.f32 %v437_v55, %v409_v37  ;;  %498 = vst [vmem:[%s1987_s20 + $0x20] sm:$0xff] %v448_v46  ;;  %v476_v12 = vadd.f32 %v437_v55, %v418_v26  ;;  %v477_v4 = vadd.f32 %v437_v55, %v419_v39  ;;  %v370_v26 = vld [vmem:[%s1956_s17 + $0x3d0] sm:$0xff]  ;;  %v371_v39 = vld [vmem:[%s1956_s17 + $0x3d8] sm:$0xff] }
 0x189   : > { %499 = vst [vmem:[%s1987_s20 + $0x28] sm:$0xff] %v449_v62  ;;  %500 = vst [vmem:[%s1987_s20 + $0x30] sm:$0xff] %v450_v41  ;;  %v478_v13 = vadd.f32 %v437_v55, %v420_v27  ;;  %v479_v18 = vadd.f32 %v437_v55, %v421_v43  ;;  %v480_v5 = vadd.f32 %v437_v55, %v422_v35  ;;  %v372_v27 = vld [vmem:[%s1956_s17 + $0x3e0] sm:$0xff] }
 0x18a   : > { %501 = vst [vmem:[%s1987_s20 + $0x38] sm:$0xff] %v451_v36  ;;  %510 = vst [vmem:[%s1987_s20 + $0x180] sm:$0xff] %v460_v31  ;;  %v481_v6 = vadd.f32 %v437_v55, %v423_v28  ;;  %v482_v57 = vadd.f32 %v437_v55, %v424_v38  ;;  %v483_v42 = vadd.f32 %v437_v55, %v425_v40  ;;  %v373_v38 = vld [vmem:[%s1956_s17 + $0x3e8] sm:$0xff]  ;;  %v374_v40 = vld [vmem:[%s1956_s17 + $0x3f0] sm:$0xff] }
 0x18b   : > { %511 = vst [vmem:[%s1987_s20 + $0x188] sm:$0xff] %v461_v61  ;;  %512 = vst [vmem:[%s1987_s20 + $0x190] sm:$0xff] %v462_v50  ;;  %v394_v24 = vmul.f32 %v2003_v15, %v336_v45  ;;  %v395_v33 = vmul.f32 %v2003_v15, %v337_v51  ;;  %v396_v25 = vmul.f32 %v2003_v15, %v338_v52  ;;  %v442_v50 = vpop.permute.xlu1 %441 }
 0x18c   : > { %513 = vst [vmem:[%s1987_s20 + $0x198] sm:$0xff] %v463_v3  ;;  %514 = vst [vmem:[%s1987_s20 + $0x1a0] sm:$0xff] %v464_v23  ;;  %v397_v37 = vmul.f32 %v2003_v15, %v339_v0  ;;  %v398_v43 = vmul.f32 %v2003_v15, %v340_v29  ;;  %v399_v55 = vmul.f32 %v2003_v15, %v341_v2 }
 0x18d   : > { %515 = vst [vmem:[%s1987_s20 + $0x1a8] sm:$0xff] %v465_v9  ;;  %516 = vst [vmem:[%s1987_s20 + $0x1b0] sm:$0xff] %v466_v8  ;;  %v400_v35 = vmul.f32 %v2003_v15, %v342_v10  ;;  %v401_v28 = vmul.f32 %v2003_v15, %v343_v30  ;;  %v410_v14 = vmul.f32 %v2003_v15, %v352_v11 }
 0x18e   : > { %517 = vst [vmem:[%s1987_s20 + $0x1b8] sm:$0xff] %v467_v7  ;;  %526 = vst [vmem:[%s1987_s20 + $0x300] sm:$0xff] %v476_v12  ;;  %v411_v54 = vmul.f32 %v2003_v15, %v353_v17  ;;  %v412_v63 = vmul.f32 %v2003_v15, %v354_v16  ;;  %v413_v46 = vmul.f32 %v2003_v15, %v355_v19 }
 0x18f   : > { %527 = vst [vmem:[%s1987_s20 + $0x308] sm:$0xff] %v477_v4  ;;  %528 = vst [vmem:[%s1987_s20 + $0x310] sm:$0xff] %v478_v13  ;;  %v414_v62 = vmul.f32 %v2003_v15, %v356_v20  ;;  %v415_v41 = vmul.f32 %v2003_v15, %v357_v44  ;;  %v416_v36 = vmul.f32 %v2003_v15, %v358_v21 }
 0x190   : > { %529 = vst [vmem:[%s1987_s20 + $0x318] sm:$0xff] %v479_v18  ;;  %530 = vst [vmem:[%s1987_s20 + $0x320] sm:$0xff] %v480_v5  ;;  %v417_v45 = vmul.f32 %v2003_v15, %v359_v48  ;;  %v426_v51 = vmul.f32 %v2003_v15, %v368_v22  ;;  %v427_v52 = vmul.f32 %v2003_v15, %v369_v56 }
 0x191   : > { %531 = vst [vmem:[%s1987_s20 + $0x328] sm:$0xff] %v481_v6  ;;  %532 = vst [vmem:[%s1987_s20 + $0x330] sm:$0xff] %v482_v57  ;;  %v428_v31 = vmul.f32 %v2003_v15, %v370_v26  ;;  %v429_v61 = vmul.f32 %v2003_v15, %v371_v39  ;;  %v430_v3 = vmul.f32 %v2003_v15, %v372_v27 }
 0x192   : > { %533 = vst [vmem:[%s1987_s20 + $0x338] sm:$0xff] %v483_v42  ;;  %v431_v0 = vmul.f32 %v2003_v15, %v373_v38  ;;  %v432_v29 = vmul.f32 %v2003_v15, %v374_v40  ;;  %v433_v2 = vmul.f32 %v2003_v15, %v375_v47  ;;  %v452_v23 = vadd.f32 %v442_v50, %v394_v24 }
 0x193   : > { %v453_v9 = vadd.f32 %v442_v50, %v395_v33  ;;  %v454_v8 = vadd.f32 %v442_v50, %v396_v25  ;;  %v455_v7 = vadd.f32 %v442_v50, %v397_v37  ;;  %v456_v10 = vadd.f32 %v442_v50, %v398_v43 }
 0x194   : > { %v457_v30 = vadd.f32 %v442_v50, %v399_v55  ;;  %v458_v11 = vadd.f32 %v442_v50, %v400_v35  ;;  %v459_v12 = vadd.f32 %v442_v50, %v401_v28  ;;  %v468_v4 = vadd.f32 %v442_v50, %v410_v14  ;;  %502 = vst [vmem:[%s1987_s20 + $0xc0] sm:$0xff] %v452_v23 }
 0x195   : > { %v469_v13 = vadd.f32 %v442_v50, %v411_v54  ;;  %v470_v18 = vadd.f32 %v442_v50, %v412_v63  ;;  %v471_v17 = vadd.f32 %v442_v50, %v413_v46  ;;  %503 = vst [vmem:[%s1987_s20 + $0xc8] sm:$0xff] %v453_v9  ;;  %504 = vst [vmem:[%s1987_s20 + $0xd0] sm:$0xff] %v454_v8 }
 0x196   : > { %505 = vst [vmem:[%s1987_s20 + $0xd8] sm:$0xff] %v455_v7  ;;  %v472_v15 = vadd.f32 %v442_v50, %v414_v62  ;;  %v473_v16 = vadd.f32 %v442_v50, %v415_v41  ;;  %v474_v19 = vadd.f32 %v442_v50, %v416_v36  ;;  %v475_v5 = vadd.f32 %v442_v50, %v417_v45 }
 0x197   : > { %506 = vst [vmem:[%s1987_s20 + $0xe0] sm:$0xff] %v456_v10  ;;  %507 = vst [vmem:[%s1987_s20 + $0xe8] sm:$0xff] %v457_v30  ;;  %v484_v6 = vadd.f32 %v442_v50, %v426_v51  ;;  %v485_v57 = vadd.f32 %v442_v50, %v427_v52  ;;  %v486_v42 = vadd.f32 %v442_v50, %v428_v31 }
 0x198   : > { %508 = vst [vmem:[%s1987_s20 + $0xf0] sm:$0xff] %v458_v11  ;;  %509 = vst [vmem:[%s1987_s20 + $0xf8] sm:$0xff] %v459_v12  ;;  %v487_v20 = vadd.f32 %v442_v50, %v429_v61  ;;  %v488_v44 = vadd.f32 %v442_v50, %v430_v3  ;;  %v489_v21 = vadd.f32 %v442_v50, %v431_v0 }
 0x199   : > { %518 = vst [vmem:[%s1987_s20 + $0x240] sm:$0xff] %v468_v4  ;;  %519 = vst [vmem:[%s1987_s20 + $0x248] sm:$0xff] %v469_v13  ;;  %v490_v48 = vadd.f32 %v442_v50, %v432_v29  ;;  %v491_v22 = vadd.f32 %v442_v50, %v433_v2 }
 0x19a   : > { %520 = vst [vmem:[%s1987_s20 + $0x250] sm:$0xff] %v470_v18  ;;  %521 = vst [vmem:[%s1987_s20 + $0x258] sm:$0xff] %v471_v17  ;;  %321 = sbr.rel (!%p319_p1) target bundleno = 252 (0xfc), region = 68 }
 0x19b   : > { %522 = vst [vmem:[%s1987_s20 + $0x260] sm:$0xff] %v472_v15  ;;  %523 = vst [vmem:[%s1987_s20 + $0x268] sm:$0xff] %v473_v16 }
 0x19c   : > { %524 = vst [vmem:[%s1987_s20 + $0x270] sm:$0xff] %v474_v19  ;;  %525 = vst [vmem:[%s1987_s20 + $0x278] sm:$0xff] %v475_v5 }
 0x19d   : > { %534 = vst [vmem:[%s1987_s20 + $0x3c0] sm:$0xff] %v484_v6  ;;  %535 = vst [vmem:[%s1987_s20 + $0x3c8] sm:$0xff] %v485_v57 }
 0x19e   : > { %536 = vst [vmem:[%s1987_s20 + $0x3d0] sm:$0xff] %v486_v42  ;;  %537 = vst [vmem:[%s1987_s20 + $0x3d8] sm:$0xff] %v487_v20 }
 0x19f   : > { %538 = vst [vmem:[%s1987_s20 + $0x3e0] sm:$0xff] %v488_v44  ;;  %539 = vst [vmem:[%s1987_s20 + $0x3e8] sm:$0xff] %v489_v21 }
 0x1a0   : > { %540 = vst [vmem:[%s1987_s20 + $0x3f0] sm:$0xff] %v490_v48  ;;  %541 = vst [vmem:[%s1987_s20 + $0x3f8] sm:$0xff] %v491_v22 }

</bundles_post_ra>
